<compile_context>
chip_gen: v6e
topology: v6e:2x2x1
jax: 0.10.0
libtpu: 0.0.40
codegen_flags: <defaults>
</compile_context>

<pallas_src>
import math

import jax
import jax.numpy as jnp
from jax.experimental import pallas as pl
from jax.experimental.pallas import tpu as pltpu


# ----------------------------- Pallas kernel ------------------------------ #
def _conv1x1_bn_kernel(x_ref, w_ref, b_ref, o_ref):
    # x_ref: (Cin, T_HW)   activation tile (lane dim = flattened H*W)
    # w_ref: (Cout, Cin)   BN-scale-folded 1x1 conv weight (resident in VMEM)
    # b_ref: (Cout, 1)     BN bias (resident in VMEM)
    # o_ref: (Cout, T_HW)  output tile (already NCHW-ordered)
    y = jnp.dot(w_ref[...], x_ref[...], preferred_element_type=jnp.float32)
    o_ref[...] = (y + b_ref[...]).astype(o_ref.dtype)


def _choose_hw_tile(hw, cin, cout, itemsize):
    """Largest lane-aligned tile of the flattened H*W axis.

    Full-extent blocks are always legal, so if H*W is not a multiple of 128 we
    take the whole axis (neck feature maps are small).  Otherwise pick the
    largest 128-multiple divisor of H*W whose double-buffered x + out tiles fit
    a ~12 MiB budget.
    """
    if hw % 128 != 0:
        return hw
    budget = 12 << 20
    cap = max(128, budget // max(1, 2 * (cin + cout) * itemsize))
    cap = max(128, min((cap // 128) * 128, hw))
    t = cap
    while hw % t != 0:
        t -= 128
    return t


def conv1x1_bn(x_nchw, w_oi, gamma, beta, mean, var, eps=1e-5):
    """1x1 conv (no bias) + BatchNorm2d (inference stats) on an NCHW tensor."""
    N, Cin, H, W = x_nchw.shape
    Cout = w_oi.shape[0]
    HW = H * W
    dtype = x_nchw.dtype
    itemsize = jnp.dtype(dtype).itemsize

    # Fold BN into the conv:  y = (scale * W) @ x + (beta - mean * scale)
    scale = gamma / jnp.sqrt(var + eps)                              # (Cout,)
    w_folded = (w_oi.astype(jnp.float32) * scale[:, None]).astype(dtype)
    bias = (beta - mean * scale).reshape(Cout, 1).astype(jnp.float32)

    x3 = x_nchw.reshape(N, Cin, HW)                     # free reshape (no HBM pass)
    t_hw = _choose_hw_tile(HW, Cin, Cout, itemsize)
    n_hw = HW // t_hw

    # Explicit scoped-VMEM limit sized to the actual buffers (2x margin),
    # clamped to stay safe on v7x's 64 MiB physical VMEM.
    need = (2 * Cin * t_hw * itemsize          # x tile, double-buffered
            + 2 * Cout * t_hw * itemsize       # out tile, double-buffered
            + 2 * Cout * Cin * itemsize        # weight (resident, 2 bufs)
            + 2 * Cout * 4)                    # bias
    vmem_limit = int(min(max(2 * need, 32 << 20), 48 << 20))
    # NOTE: for very large Cout*Cin (e.g. 2048x2048) a Cout grid axis would be
    # needed to keep the weight tile in VMEM; not required at these sizes.

    out3 = pl.pallas_call(
        _conv1x1_bn_kernel,
        out_shape=jax.ShapeDtypeStruct((N, Cout, HW), dtype),
        grid_spec=pltpu.PrefetchScalarGridSpec(
            num_scalar_prefetch=0,
            grid=(N, n_hw),
            in_specs=[
                pl.BlockSpec((None, Cin, t_hw), lambda n, h: (n, 0, h)),
                # Weight / bias index maps are constant across the grid, so
                # they are fetched once and stay resident in VMEM.
                pl.BlockSpec((Cout, Cin), lambda n, h: (0, 0)),
                pl.BlockSpec((Cout, 1), lambda n, h: (0, 0)),
            ],
            out_specs=pl.BlockSpec((None, Cout, t_hw), lambda n, h: (n, 0, h)),
        ),
        compiler_params=pltpu.CompilerParams(
            dimension_semantics=("parallel", "parallel"),
            vmem_limit_bytes=vmem_limit),
    )(x3, w_folded, bias)

    return out3.reshape(N, Cout, H, W)                  # free reshape back to NCHW


# ---------------------------- Module semantics ----------------------------- #
def adjust_layer(x, params):
    """AdjustLayer.forward: conv1x1 + BN, center crop when spatial < 20.

    The PyTorch module crops AFTER conv+BN; since the 1x1 conv preserves the
    spatial size and commutes with slicing, cropping first gives identical
    results with 4x less conv work on the template branch.
    """
    if x.shape[3] < 20:
        l = 4
        r = l + 8 if (x.shape[3] % 2 == 0) else l + 7
        x = x[:, :, l:r, l:r]
    return conv1x1_bn(x, params["w"], params["gamma"], params["beta"],
                      params["mean"], params["var"])


def adjust_all_layer_vlt(features, layer_params, backbone_same=False,
                         template=False):
    """AdjustAllLayer_VLT.forward.

    layer_params[i] corresponds to PyTorch submodule 'downsample{i+2}'.
    """
    num = len(layer_params)
    if features[-1].shape[-1] < 20:
        template = True
    if num == 1:
        # TODO(synk): PyTorch's num==1 branch passes the whole feature *list*
        # to a single AdjustLayer (likely a latent bug there); not exercised.
        return adjust_layer(features[0], layer_params[0])
    out = []
    n = num if backbone_same else num // 2
    if backbone_same or template:
        for i in range(n):
            out.append(adjust_layer(features[i], layer_params[i]))
    else:
        for i in range(n):
            out.append(adjust_layer(features[i], layer_params[i + n]))
    return out


# ------------------------- Deterministic init ------------------------------ #
def init_adjust_layer_params(key, cin, cout):
    # Conv2d weight (cout, cin, 1, 1): normal(0, sqrt(2 / fan_out)),
    # fan_out = k*k*cout = cout.  BN: gamma=1, beta=0, running mean/var = 0/1.
    std = math.sqrt(2.0 / float(cout))
    w = std * jax.random.normal(key, (cout, cin), dtype=jnp.float32)
    return dict(
        w=w,
        gamma=jnp.ones((cout,), jnp.float32),
        beta=jnp.zeros((cout,), jnp.float32),
        mean=jnp.zeros((cout,), jnp.float32),
        var=jnp.ones((cout,), jnp.float32),
    )


# ---------------------------- Pure-JAX reference ---------------------------- #
def _ref_adjust_layer(x, p, eps=1e-5):
    # PyTorch order: conv -> BN -> crop (validates the crop-before-conv fusion).
    y = jnp.einsum("nchw,oc->nohw", x, p["w"])
    scale = p["gamma"] / jnp.sqrt(p["var"] + eps)
    shift = p["beta"] - p["mean"] * scale
    y = y * scale[None, :, None, None] + shift[None, :, None, None]
    if y.shape[3] < 20:
        l = 4
        r = l + 8 if (y.shape[3] % 2 == 0) else l + 7
        y = y[:, :, l:r, l:r]
    return y


if __name__ == "__main__":
    key = jax.random.PRNGKey(0)

    # Small stand-ins for in_channels=[512,1024,2048]: [8, 16, 32]
    in_channels = [8, 16, 32]
    out_channels = [8, 16, 32]
    num = len(in_channels)
    keys = jax.random.split(key, 2 * num + 2)
    layer_params = [
        init_adjust_layer_params(keys[i], in_channels[i], out_channels[i])
        for i in range(num)
    ]

    # ---- Case 1: template branch (spatial 16 < 20 -> crop to 8x8) ---------- #
    N, H, W = 2, 16, 16
    features_t = [
        jax.random.normal(keys[num + i], (N, in_channels[i], H, W),
                          dtype=jnp.float32)
        for i in range(num)
    ]
    out_t = adjust_all_layer_vlt(features_t, layer_params, backbone_same=False)
    out_t = jax.block_until_ready(out_t)
    ref_t = _ref_adjust_layer(features_t[0], layer_params[0])
    assert out_t[0].shape == (N, out_channels[0], 8, 8), out_t[0].shape
    assert bool(jnp.allclose(out_t[0], ref_t, atol=1e-4, rtol=1e-4))

    # ---- Case 2: search branch (spatial 32 >= 20 -> no crop, lane-dense HW,
    #      uses downsample{i+2+len}, i.e. layer_params[i + num//2]) ----------- #
    n = num // 2
    Hs = Ws = 32
    features_s = [
        jax.random.normal(keys[2 * num], (N, in_channels[n], Hs, Ws),
                          dtype=jnp.float32),
        jax.random.normal(keys[2 * num + 1], (N, in_channels[-1], Hs, Ws),
                          dtype=jnp.float32),
    ]
    out_s = adjust_all_layer_vlt(features_s, layer_params, backbone_same=False)
    out_s = jax.block_until_ready(out_s)
    ref_s = _ref_adjust_layer(features_s[0], layer_params[n])
    assert out_s[0].shape == (N, out_channels[n], Hs, Ws), out_s[0].shape
    assert bool(jnp.allclose(out_s[0], ref_s, atol=1e-4, rtol=1e-4))

    print("KERNEL_OK")
</pallas_src>

<mosaic_0001>
module attributes {stable_mosaic.version = 11 : i64} {
  func.func @_conv1x1_bn_kernel(%arg0: i32, %arg1: i32, %arg2: memref<1x8x64xf32, #tpu.memory_space<vmem>>, %arg3: memref<8x8xf32, #tpu.memory_space<vmem>>, %arg4: memref<8x1xf32, #tpu.memory_space<vmem>>, %arg5: memref<1x8x64xf32, #tpu.memory_space<vmem>>) attributes {dimension_semantics = [#tpu.dimension_semantics<parallel>, #tpu.dimension_semantics<parallel>], iteration_bounds = array<i64: 2, 1>, scalar_prefetch = 0 : i64, scratch_operands = 0 : i64, tpu.core_type = #tpu.core_type<tc>, window_params = [{transform_indices = @transform_0, window_bounds = array<i64: 1, 8, 64>}, {pipeline_mode = #tpu.pipeline_mode<synchronous>, transform_indices = @transform_1, window_bounds = array<i64: 8, 8>}, {pipeline_mode = #tpu.pipeline_mode<synchronous>, transform_indices = @transform_2, window_bounds = array<i64: 8, 1>}, {transform_indices = @transform_3, window_bounds = array<i64: 1, 8, 64>}]} {
    %c0 = arith.constant 0 : index
    %c0_0 = arith.constant 0 : index
    %0 = vector.load %arg3[%c0, %c0_0] : memref<8x8xf32, #tpu.memory_space<vmem>>, vector<8x8xf32>
    %c0_1 = arith.constant 0 : index
    %c0_2 = arith.constant 0 : index
    %c0_3 = arith.constant 0 : index
    %1 = vector.load %arg2[%c0_1, %c0_2, %c0_3] : memref<1x8x64xf32, #tpu.memory_space<vmem>>, vector<1x8x64xf32>
    %2 = vector.shape_cast %1 : vector<1x8x64xf32> to vector<8x64xf32>
    %cst = arith.constant dense<0.000000e+00> : vector<8x64xf32>
    %3 = tpu.matmul %0, %2, %cst {dimension_numbers = #tpu.dot_dimension_numbers<[1], [0], [0], [1], [0, 0, 1, 1], [], []>} : vector<8x8xf32>, vector<8x64xf32>, vector<8x64xf32> -> vector<8x64xf32>
    %c0_4 = arith.constant 0 : index
    %c0_5 = arith.constant 0 : index
    %4 = vector.load %arg4[%c0_4, %c0_5] : memref<8x1xf32, #tpu.memory_space<vmem>>, vector<8x1xf32>
    %5 = vector.broadcast %4 : vector<8x1xf32> to vector<8x64xf32>
    %6 = arith.addf %3, %5 : vector<8x64xf32>
    %c0_6 = arith.constant 0 : index
    %c0_7 = arith.constant 0 : index
    %c0_8 = arith.constant 0 : index
    %7 = vector.load %arg5[%c0_6, %c0_7, %c0_8] : memref<1x8x64xf32, #tpu.memory_space<vmem>>, vector<1x8x64xf32>
    %8 = vector.shape_cast %7 : vector<1x8x64xf32> to vector<8x64xf32>
    %9 = vector.shape_cast %6 : vector<8x64xf32> to vector<1x8x64xf32>
    tpu.vector_store %arg5[%c0_6, %c0_7, %c0_8], %9 {strides = array<i32>} : memref<1x8x64xf32, #tpu.memory_space<vmem>>, vector<1x8x64xf32>,
    return
  }
  func.func @transform_0(%arg0: i32, %arg1: i32) -> (i32, i32, i32) {
    %c0_i32 = arith.constant 0 : i32
    %c0_i32_0 = arith.constant 0 : i32
    return %arg0, %c0_i32, %arg1 : i32, i32, i32
  }
  func.func @transform_1(%arg0: i32, %arg1: i32) -> (i32, i32) {
    %c0_i32 = arith.constant 0 : i32
    %c0_i32_0 = arith.constant 0 : i32
    %c0_i32_1 = arith.constant 0 : i32
    return %c0_i32, %c0_i32_0 : i32, i32
  }
  func.func @transform_2(%arg0: i32, %arg1: i32) -> (i32, i32) {
    %c0_i32 = arith.constant 0 : i32
    %c0_i32_0 = arith.constant 0 : i32
    %c0_i32_1 = arith.constant 0 : i32
    return %c0_i32, %c0_i32_0 : i32, i32
  }
  func.func @transform_3(%arg0: i32, %arg1: i32) -> (i32, i32, i32) {
    %c0_i32 = arith.constant 0 : i32
    %c0_i32_0 = arith.constant 0 : i32
    return %arg0, %c0_i32, %arg1 : i32, i32, i32
  }
}

</mosaic_0001>

<bundles_post_ra>
// kernel: tpu_custom_call.1
= control target key start
LH: loop header
LB: loop body
LE: loop exit
PB: predicated region body
PF: predicated region fallthrough
CT: control target
= control target key end

     0   :  { %8 = vsyncpa [#allocation3], 0  ;;  %s750_s0 = inlined_call_operand.hbm [shape: f32[2,8,64], index: 0, kind: input, shape index: {}]   ;;  %s751_s1 = inlined_call_operand.vmem [shape: f32[8,8], index: 1, kind: input, shape index: {}]   ;;  %s752_s2 = inlined_call_operand.vmem [shape: f32[8,1], index: 2, kind: input, shape index: {}]   ;;  %s753_s3 = inlined_call_operand.hbm [shape: f32[2,8,64], index: 3, kind: output, shape index: {}]  }
   0x1   :  { %10 = vsyncpa [#allocation3 + $0x1], 0 }
   0x2   :  { %11 = vsyncpa [#allocation4], 0 }
   0x3   :  { %13 = vsyncpa [#allocation4 + $0x1], 0  ;;  %s604_s12 = smov 0   ;;  %s606_s13 = smov 0  }
   0x4   :  { %s608_s14 = smov 0   ;;  %s610_s15 = smov 0  }
   0x5   :  { %s612_s16 = smov 0   ;;  %s614_s17 = smov 0  }
   0x6 LB: > { %s382_s18 = sadd.s32 4294967295, %s577_s17   ;;  %s383_s19 = sadd.s32 4294967294, %s577_s17   ;;  %s577_s17 = sphi %s614_s17, %s19_s17   ;;  %s573_s16 = sphi %s612_s16, %s765_s16   ;;  %s569_s15 = sphi %s610_s15, %s764_s15   ;;  %s565_s14 = sphi %s608_s14, %s763_s14   ;;  %s561_s13 = sphi %s606_s13, %s762_s13   ;;  %s557_s12 = sphi %s604_s12, %s761_s12  }
   0x7   : > { %s31_s20 = sadd.s32 1, %s573_s16  ;;  %s40_s21 = sadd.s32 1, %s565_s14 }
   0x8   : > { %p33_p0 = scmp.ge.s32.totalorder %s31_s20, 2  ;;  %p47_p1 = scmp.ne.s32.totalorder %s565_s14, %s561_s13 }
   0x9   : > { %p48_p2 = scmp.eq.s32.totalorder %s577_s17, 0  ;;  %p53_p3 = scmp.ne.s32.totalorder %s561_s13, %s557_s12 }
   0xa   : > { %s767_s20 = smov (%p33_p0, %s31_s20), 0  ;;  %p54_p5 = scmp.eq.s32.totalorder %s382_s18, 0 }
   0xb   : > { %p645_p4 = por %p48_p2, %p47_p1  ;;  %s35_s23 = ssub.s32 %s573_s16, %s767_s20 }
   0xc   : > { %p121_p6 = scmp.eq.s32.totalorder %s382_s18, 1  ;;  %p38_p7 = scmp.eq.s32.totalorder %s35_s23, 0 }
   0xd   : > { %p651_p8 = por %p54_p5, %p53_p3  ;;  %p127_p10 = scmp.eq.s32.totalorder %s383_s19, 1 }
   0xe   : > { %p655_p9 = por %p121_p6, %p47_p1  ;;  %p415_p13 = scmp.lt.s32.totalorder %s577_s17, 2 }
   0xf   : > { %s660_s26 = scalar_select %p38_p7, %s565_s14, %s40_s21  }
  0x10   : > { %p662_p11 = por %p127_p10, %p53_p3  ;;  %s153_s28 = sand.u32 1, %s565_s14  }
  0x11   : > { %s386_s29 = sshll.u32 %s153_s28, 3  ;;  %s387_s30 = sshll.u32 %s573_s16, 7 }
  0x12   : > { %s757_s27 = scalar_select %p662_p11, 1, 0 }
  0x13   : > { %s163_s6 = scalar_lea.hbm %s750_s0, %s387_s30  ;;  %s157_s7 = scalar_lea.vmem [#allocation2], %s386_s29 }
  0x14   : > { %s165_s8 = sshll.u32 %s157_s7, 4  ;;  %p675_p0 = pnand %p415_p13, %p645_p4  ;;  %s166_s8 = int_to_ptr.vmem [resolvable:$true] %s165_s8 }
  0x15   : > { %p388_p1 = scmp.ge.s32.totalorder %s577_s17, 1  ;;  %p170_p2 = scmp.lt.s32.totalorder %s577_s17, 3 }
  0x16   : > { %s154_s10 = scalar_lea.sflag [#allocation3], %s153_s28  ;;  %p471_p3 = pneg %p675_p0 }
  0x17   : > { %s482_s11 = scalar_lea.vmem %s166_s8, 128  ;;  %s579_s18 = smov [#allocation2]  }
  0x18   : > { %p483_p5 = scmp.ne.s32.totalorder %s166_s8, %s482_s11  ;;  %s487_s19 = sshll.u32 %s579_s18, 4  ;;  %s488_s19 = int_to_ptr.vmem [resolvable:$false] %s487_s19 }
  0x19   : > { %s489_s21 = scalar_lea.vmem %s488_s19, 256  ;;  %p490_p10 = scmp.lt.s32.totalorder %s166_s8, %s488_s19 }
  0x1a   : > { %p485_p6 = pnand %p483_p5, %p471_p3  ;;  %p491_p12 = scmp.lt.s32.totalorder %s489_s21, %s482_s11 }
  0x1c   : > { %p486_p7 = pneg %p485_p6  ;;  %p492_p4 = por %p491_p12, %p490_p10 }
  0x1e   : > { %p493_p13 = pnand %p492_p4, %p486_p7 }
  0x20   : > { %496 = shalt.err (!%p493_p13)
}
  0x21   : > { %410 = dma.hbm_to_vmem [thread:$0]  (!%p675_p0), %s163_s6, 128, %s166_s8, %s154_s10  }
  0x22   : > { %p171_p11 = pnand %p388_p1, %p170_p2 }
  0x23   : > { %s690_s22 = sand.u32 (!%p171_p11), 1, %s561_s13  }
  0x24   : > { %174 = sbr.rel (%p171_p11) target bundleno = 253 (0xfd), region = 32  ;;  %s389_s23 = sshll.u32 (!%p171_p11), %s690_s22, 3 }
  0x25   : > { %s177_s28 = scalar_lea.sflag (!%p171_p11), [#allocation3], %s690_s22  ;;  %s180_s29 = scalar_lea.vmem (!%p171_p11), [#allocation2], %s389_s23 }
  0x29   : > { %548 = dma.done.wait (%p651_p8), %s177_s28, 128  }
  0x2a   : > { %550 = vsyncadd (%p651_p8), %s177_s28, 4294967168  ;;  %v580_v0 = vmov 0.0   ;;  %vm581_vm0 = vmmov 0   ;;  %v582_v1 = vmov 0   ;;  %vm211_vm1 = vcmask 64512   ;;  %v204_v2 = vld [vmem:[%s180_s29] sm:$0xff] }
  0x2b   : > { %398 = vmatprep.subr.mxu0 %v580_v0  ;;  %400 = vmatprep.mubr.msk.f32.mxu0 %vm581_vm0, %v580_v0  ;;  %v203_v3 = vld [vmem:[%s751_s1] sm:$0xff]  ;;  %s393_s24 = sshll.u32 %s569_s15, 7  ;;  %s202_s7 = scalar_lea.vmem [#allocation5], %s389_s23  ;;  %vm285_vm2 = vcmask 523264  }
  0x2c   : > { %468 = vset.pattern.permute.xlu0 %v582_v1  ;;  %v205_v4 = vld [vmem:[%s752_s2] sm:$0xff]  ;;  %399 = vmatpush3.msra.mxu0 %v204_v2  ;;  %s302_s8 = sshll.u32 %s202_s7, 4  ;;  %s708_s11 = scalar_lea.hbm %s753_s3, %s393_s24  ;;  %s303_s8 = int_to_ptr.vmem [resolvable:$true] %s302_s8 }
  0x2d   : > { %208 = vperm.xlu0 %468, %v205_v4   ;;  %401 = vmatmul.mubr.msk.f32.vlgmr.msra.gmra.mxu0 %vm211_vm1, %v203_v3  ;;  %s288_s18 = scalar_lea.sflag [#allocation4], %s690_s22  ;;  %s497_s19 = scalar_lea.vmem %s303_s8, 128 }
  0x2e   : > { %p498_p8 = scmp.ne.s32.totalorder %s303_s8, %s497_s19  ;;  %s583_s15 = smov [#allocation5]  }
  0x2f   : > { %s501_s21 = sshll.u32 %s583_s15, 4  ;;  %s502_s21 = int_to_ptr.vmem [resolvable:$false] %s501_s21 }
  0x30   : > { %p499_p11 = pnand %p498_p8, %p655_p9  ;;  %s503_s23 = scalar_lea.vmem %s502_s21, 256 }
  0x31   : > { %p504_p0 = scmp.lt.s32.totalorder %s303_s8, %s502_s21  ;;  %p505_p1 = scmp.lt.s32.totalorder %s503_s23, %s497_s19 }
  0x32   : > { %p500_p12 = pneg %p499_p11 }
  0x33   : > { %p506_p2 = por %p505_p1, %p504_p0 }
  0x35   : > { %p507_p3 = pnand %p506_p2, %p500_p12 }
  0xa8   : > { %v209_v5 = vpop.permute.xlu0 %208 }
  0xed   : > { %v281_v6 = vpop.f32.mrf.mxu0 }
  0xee   : > { %v282_v7 = vadd.f32 %v281_v6, %v209_v5 }
  0xef   : > { %v402_v8 = vpop.f32.mrf.mxu0 }
  0xf0   : > { %286 = vst.msk [vmem:[%s202_s7] sm:$0xff] %vm285_vm2, %v282_v7 }
  0xf1   : > { %510 = shalt.err (!%p507_p3)
}
  0xf2   : > { %s511_s28 = scalar_lea.hbm %s708_s11, 128  ;;  %s515_s30 = scalar_lea.hbm %s753_s3, 256 }
  0xf3   : > { %p512_p5 = scmp.ne.s32.totalorder %s708_s11, %s511_s28  ;;  %p516_p10 = scmp.lt.s32.totalorder %s708_s11, %s753_s3 }
  0xf4   : > { %p517_p4 = scmp.lt.s32.totalorder %s515_s30, %s511_s28 }
  0xf5   : > { %p513_p6 = pnand %p512_p5, %p655_p9 }
  0xf6   : > { %p518_p13 = por %p517_p4, %p516_p10 }
  0xf7   : > { %p514_p7 = pneg %p513_p6 }
  0xf9   : > { %p519_p8 = pnand %p518_p13, %p514_p7 }
  0xfb   : > { %522 = shalt.err (!%p519_p8)
}
  0xfc   : > { %405 = dma.vmem_to_hbm [thread:$0]  (%p655_p9), %s303_s8, 128, %s708_s11, %s288_s18  }
  0xfd PF: > { %s314_s6 = sand.u32 1, %s557_s12   ;;  %p759_p11 = scmp.ne.s32.totalorder %s757_s27, 0 }
  0xfe   : > { %p760_p12 = scmp.ge.s32.totalorder %s577_s17, 2  ;;  %s315_s24 = scalar_lea.sflag [#allocation4], %s314_s6 }
 0x100   : > { %p412_p0 = pnand %p760_p12, %p759_p11 }
 0x102   : > { %p413_p1 = pneg %p412_p0 }
 0x104   : > { %552 = dma.done.wait (%p413_p1), %s315_s24, 128  }
 0x105   : > { %554 = vsyncadd (%p413_p1), %s315_s24, 4294967168  ;;  %s19_s17 = sadd.s32 1, %s577_s17   ;;  %s761_s12 = smov %s561_s13 }
 0x106   : > { %p16_p2 = scmp.ge.s32.totalorder %s19_s17, 4   ;;  %s762_s13 = smov %s565_s14 }
 0x107   : > { %s763_s14 = smov %s660_s26  ;;  %s764_s15 = smov %s573_s16 }
 0x108   : > { %s765_s16 = smov %s767_s20  ;;  %18 = sbr.rel (!%p16_p2) target bundleno = 6 (0x6), region = 77 }
 0x10d   :  { %320 = vsyncpa [#allocation3], 1 }
 0x10e   :  { %322 = vsyncpa [#allocation3 + $0x1], 1 }
 0x10f   :  { %323 = vsyncpa [#allocation4], 1 }
 0x110   :  { %325 = vsyncpa [#allocation4 + $0x1], 1 }

</bundles_post_ra>
